<compile_context>
chip_gen: v7x
topology: tpu7x:2x2x1
jax: 0.10.0
libtpu: 0.0.40
codegen_flags: <defaults>
</compile_context>

<pallas_src>
import functools

import jax
import jax.numpy as jnp
import numpy as np
from jax import lax
from jax.experimental import pallas as pl
from jax.experimental.pallas import tpu as pltpu

LANE = 128


def _dice_sums_kernel(x_ref, t_ref, out_ref, *, n_classes, apply_softmax,
                      tiles_per_partial, tile_s, hw):
    """Accumulate per-class (intersect, y_sum, z_sum) over one spatial tile.

    x_ref:   (C, tile_s, 128) scores in their native dtype.
    t_ref:   (1, tile_s, 128) int32 labels.
    out_ref: (3, C, 1) float32 accumulator, resident across the (n, tile) axes.
    """
    p_id = pl.program_id(0)   # partial-sum (parallel) axis
    n_id = pl.program_id(1)   # batch axis (reduction)
    i_id = pl.program_id(2)   # spatial-tile axis within this partial (reduction)

    @pl.when((n_id == 0) & (i_id == 0))
    def _init():
        out_ref[...] = jnp.zeros_like(out_ref)

    x = x_ref[...].astype(jnp.float32)            # (C, TS, L)
    t = t_ref[...].astype(jnp.int32)              # (1, TS, L)
    ts, ln = x.shape[1], x.shape[2]

    # Flat pixel index of every element of this tile; masks (a) the ragged last
    # tile, (b) the H*W -> S*128 remainder, (c) duplicated tiles from the
    # partial split (their block index was clamped in the index_map).
    row0 = (p_id * tiles_per_partial + i_id) * tile_s
    rows = row0 + lax.broadcasted_iota(jnp.int32, (1, ts, ln), 1)
    cols = lax.broadcasted_iota(jnp.int32, (1, ts, ln), 2)
    valid = (rows * ln + cols) < hw               # (1, TS, L) bool

    if apply_softmax:
        x = jnp.where(valid, x, 0.0)              # keep garbage out of exp
        m = jnp.max(x, axis=0, keepdims=True)     # per-pixel max over classes
        e = jnp.exp(x - m)
        x = e / jnp.sum(e, axis=0, keepdims=True)

    s = jnp.where(valid, x, 0.0)                                  # masked scores
    cls = jnp.arange(n_classes, dtype=jnp.int32).reshape(n_classes, 1, 1)
    onehot = jnp.where(valid & (t == cls), 1.0, 0.0)              # masked one-hot

    def _reduce(v):                                # (C, TS, L) -> (C, 1)
        return jnp.sum(jnp.sum(v, axis=2), axis=1, keepdims=True)

    out_ref[0] += _reduce(s * onehot)              # intersect
    out_ref[1] += _reduce(onehot)                  # y_sum (onehot^2 == onehot)
    out_ref[2] += _reduce(s * s)                   # z_sum


def dice_loss_pallas(inputs, target, n_classes, weight=None, softmax=False,
                     *, tile_bytes=2 * 1024 * 1024, num_partials=2):
    """Pallas TPU implementation of DiceLoss.forward.

    inputs: (N, C, H, W) scores (any float dtype), target: (N, H, W) int labels.
    Returns the scalar float32 loss.
    """
    N, C, H, W = inputs.shape
    assert C == n_classes, (C, n_classes)
    HW = H * W
    S = pl.cdiv(HW, LANE)

    x = inputs.reshape(N, C, HW)                  # contiguous -> free, no upcast
    t = target.reshape(N, 1, HW)
    if t.dtype != jnp.int32:
        # TODO(synk): accept int16/int8 labels directly (minding their
        # (16/32, 128) sublane tiling) to shrink label HBM traffic further.
        t = t.astype(jnp.int32)
    if S * LANE != HW:
        # Rare fallback: H*W not a multiple of 128; pad once so the (S, 128)
        # re-view exists.  Pad values are fully masked in-kernel anyway.
        x = jnp.pad(x, ((0, 0), (0, 0), (0, S * LANE - HW)))
        t = jnp.pad(t, ((0, 0), (0, 0), (0, S * LANE - HW)), constant_values=-1)
    x = x.reshape(N, C, S, LANE)                  # contiguous -> free
    t = t.reshape(N, 1, S, LANE)

    # ~tile_bytes of scores per block, sublane-aligned (multiple of 8 rows or
    # the full extent).  Double-buffered this stays well under the scoped-VMEM
    # default on v5e/v6e/v7x.
    itemsize = jnp.dtype(x.dtype).itemsize
    tile_s = min(S, max(8, (tile_bytes // (C * LANE * itemsize)) // 8 * 8))
    n_tiles = pl.cdiv(S, tile_s)
    num_p = max(1, min(num_partials, n_tiles))    # v7x: 2 TCs -> 2 partials
    tiles_pp = pl.cdiv(n_tiles, num_p)

    def x_map(p, n, i):
        return (n, 0, jnp.minimum(p * tiles_pp + i, n_tiles - 1), 0)

    def t_map(p, n, i):
        return (n, 0, jnp.minimum(p * tiles_pp + i, n_tiles - 1), 0)

    def o_map(p, n, i):
        return (p, 0, 0, 0)

    kernel = functools.partial(
        _dice_sums_kernel, n_classes=C, apply_softmax=bool(softmax),
        tiles_per_partial=tiles_pp, tile_s=tile_s, hw=HW)

    sums = pl.pallas_call(
        kernel,
        out_shape=jax.ShapeDtypeStruct((num_p, 3, C, 1), jnp.float32),
        grid_spec=pltpu.PrefetchScalarGridSpec(
            num_scalar_prefetch=0,
            grid=(num_p, N, tiles_pp),
            in_specs=[
                pl.BlockSpec((pl.Squeezed(), C, tile_s, LANE), x_map),
                pl.BlockSpec((pl.Squeezed(), 1, tile_s, LANE), t_map),
            ],
            out_specs=pl.BlockSpec((pl.Squeezed(), 3, C, 1), o_map),
        ),
        compiler_params=pltpu.CompilerParams(
            dimension_semantics=("parallel", "arbitrary", "arbitrary")),
    )(x, t)

    total = jnp.sum(sums, axis=0)[..., 0]         # (3, C)
    intersect, y_sum, z_sum = total[0], total[1], total[2]

    smooth = 1e-5
    dice = 1.0 - (2.0 * intersect + smooth) / (z_sum + y_sum + smooth)
    if weight is None:
        w = jnp.ones((C,), jnp.float32)
    else:
        w = jnp.asarray(weight, jnp.float32)
    return jnp.sum(dice * w) / n_classes


def dice_loss_ref(inputs, target, n_classes, weight=None, softmax=False):
    """Pure-JAX reference mirroring the PyTorch module (f32 math)."""
    xf = inputs.astype(jnp.float32)
    x = jax.nn.softmax(xf, axis=1) if softmax else xf
    onehot = (target[:, None, :, :] ==
              jnp.arange(n_classes)[None, :, None, None]).astype(jnp.float32)
    if weight is None:
        weight = [1.0] * n_classes
    smooth = 1e-5
    loss = 0.0
    for i in range(n_classes):
        s = x[:, i]
        tgt = onehot[:, i]
        intersect = jnp.sum(s * tgt)
        y_sum = jnp.sum(tgt * tgt)
        z_sum = jnp.sum(s * s)
        d = 1.0 - (2.0 * intersect + smooth) / (z_sum + y_sum + smooth)
        loss = loss + d * weight[i]
    return loss / n_classes


if __name__ == "__main__":
    key = jax.random.PRNGKey(0)
    k1, k2, k3, k4, k5, k6 = jax.random.split(key, 6)

    # Case 1: f32 scores, no softmax, shapes from the module spec.
    N, C, H, W = 2, 4, 16, 16
    x1 = jax.random.normal(k1, (N, C, H, W), dtype=jnp.float32)
    t1 = jax.random.randint(k2, (N, H, W), 0, C, dtype=jnp.int32)
    out1 = jax.block_until_ready(dice_loss_pallas(x1, t1, C, softmax=False))
    ref1 = dice_loss_ref(x1, t1, C, softmax=False)
    np.testing.assert_allclose(np.asarray(out1), np.asarray(ref1),
                               rtol=1e-4, atol=1e-5)

    # Case 2: bf16 scores + softmax + class weights; H*W not a multiple of 128
    # (exercises the masked tail / pad fallback path).
    N2, C2, H2, W2 = 2, 3, 20, 20
    x2 = jax.random.normal(k3, (N2, C2, H2, W2), jnp.float32).astype(jnp.bfloat16)
    t2 = jax.random.randint(k4, (N2, H2, W2), 0, C2, dtype=jnp.int32)
    w2 = [0.5, 1.0, 2.0]
    out2 = jax.block_until_ready(
        dice_loss_pallas(x2, t2, C2, weight=w2, softmax=True))
    ref2 = dice_loss_ref(x2, t2, C2, weight=w2, softmax=True)
    np.testing.assert_allclose(np.asarray(out2), np.asarray(ref2),
                               rtol=2e-4, atol=1e-5)

    # Case 3: small tile forces multiple spatial tiles + the 2-way parallel
    # partial-sum axis (ragged last tile fully exercised).
    N3, C3, H3, W3 = 1, 4, 32, 48
    x3 = jax.random.normal(k5, (N3, C3, H3, W3), dtype=jnp.float32)
    t3 = jax.random.randint(k6, (N3, H3, W3), 0, C3, dtype=jnp.int32)
    out3 = jax.block_until_ready(
        dice_loss_pallas(x3, t3, C3, softmax=True, tile_bytes=8192))
    ref3 = dice_loss_ref(x3, t3, C3, softmax=True)
    np.testing.assert_allclose(np.asarray(out3), np.asarray(ref3),
                               rtol=1e-4, atol=1e-5)

    print("KERNEL_OK")
</pallas_src>

<mosaic_0001>
module attributes {stable_mosaic.version = 11 : i64} {
  func.func @_dice_sums_kernel(%arg0: i32, %arg1: i32, %arg2: i32, %arg3: memref<1x4x2x128xf32, #tpu.memory_space<vmem>>, %arg4: memref<1x1x2x128xi32, #tpu.memory_space<vmem>>, %arg5: memref<1x3x4x1xf32, #tpu.memory_space<vmem>>) attributes {dimension_semantics = [#tpu.dimension_semantics<parallel>, #tpu.dimension_semantics<arbitrary>, #tpu.dimension_semantics<arbitrary>], iteration_bounds = array<i64: 1, 2, 1>, scalar_prefetch = 0 : i64, scratch_operands = 0 : i64, tpu.core_type = #tpu.core_type<tc>, window_params = [{transform_indices = @transform_0, window_bounds = array<i64: 1, 4, 2, 128>}, {transform_indices = @transform_1, window_bounds = array<i64: 1, 1, 2, 128>}, {transform_indices = @transform_2, window_bounds = array<i64: 1, 3, 4, 1>}]} {
    %c0_i32 = arith.constant 0 : i32
    %0 = arith.cmpi eq, %arg1, %c0_i32 : i32
    %c0_i32_0 = arith.constant 0 : i32
    %1 = arith.cmpi eq, %arg2, %c0_i32_0 : i32
    %2 = arith.andi %0, %1 : i1
    %3 = arith.extui %2 : i1 to i32
    %c0_i32_1 = arith.constant 0 : i32
    %4 = arith.cmpi ne, %3, %c0_i32_1 : i32
    scf.if %4 {
      %cst_39 = arith.constant 0.000000e+00 : f32
      %65 = vector.broadcast %cst_39 : f32 to vector<3x4x1xf32>
      %c0_40 = arith.constant 0 : index
      %c0_41 = arith.constant 0 : index
      %c0_42 = arith.constant 0 : index
      %c0_43 = arith.constant 0 : index
      %66 = vector.load %arg5[%c0_40, %c0_41, %c0_42, %c0_43] : memref<1x3x4x1xf32, #tpu.memory_space<vmem>>, vector<1x3x4x1xf32>
      %67 = vector.shape_cast %66 : vector<1x3x4x1xf32> to vector<3x4x1xf32>
      %68 = vector.shape_cast %65 : vector<3x4x1xf32> to vector<1x3x4x1xf32>
      tpu.vector_store %arg5[%c0_40, %c0_41, %c0_42, %c0_43], %68 {strides = array<i32>} : memref<1x3x4x1xf32, #tpu.memory_space<vmem>>, vector<1x3x4x1xf32>,
    } else {
    }
    %c0 = arith.constant 0 : index
    %c0_2 = arith.constant 0 : index
    %c0_3 = arith.constant 0 : index
    %c0_4 = arith.constant 0 : index
    %5 = vector.load %arg3[%c0, %c0_2, %c0_3, %c0_4] : memref<1x4x2x128xf32, #tpu.memory_space<vmem>>, vector<1x4x2x128xf32>
    %6 = vector.shape_cast %5 : vector<1x4x2x128xf32> to vector<4x2x128xf32>
    %c0_5 = arith.constant 0 : index
    %c0_6 = arith.constant 0 : index
    %c0_7 = arith.constant 0 : index
    %c0_8 = arith.constant 0 : index
    %7 = vector.load %arg4[%c0_5, %c0_6, %c0_7, %c0_8] : memref<1x1x2x128xi32, #tpu.memory_space<vmem>>, vector<1x1x2x128xi32>
    %8 = vector.shape_cast %7 : vector<1x1x2x128xi32> to vector<1x2x128xi32>
    %c1_i32 = arith.constant 1 : i32
    %9 = arith.muli %arg0, %c1_i32 : i32
    %10 = arith.addi %9, %arg2 : i32
    %c2_i32 = arith.constant 2 : i32
    %11 = arith.muli %10, %c2_i32 : i32
    %12 = tpu.iota {dimensions = array<i32: 1>} : vector<1x2x128xi32>
    %13 = vector.broadcast %11 : i32 to vector<1x2x128xi32>
    %14 = arith.addi %13, %12 : vector<1x2x128xi32>
    %15 = tpu.iota {dimensions = array<i32: 2>} : vector<1x2x128xi32>
    %c128_i32 = arith.constant 128 : i32
    %16 = vector.broadcast %c128_i32 : i32 to vector<1x2x128xi32>
    %17 = arith.muli %14, %16 : vector<1x2x128xi32>
    %18 = arith.addi %17, %15 : vector<1x2x128xi32>
    %c256_i32 = arith.constant 256 : i32
    %19 = vector.broadcast %c256_i32 : i32 to vector<1x2x128xi32>
    %20 = arith.cmpi slt, %18, %19 : vector<1x2x128xi32>
    %cst = arith.constant 0.000000e+00 : f32
    %21 = vector.shape_cast %20 : vector<1x2x128xi1> to vector<1x2x128xi1>
    %22 = vector.broadcast %21 : vector<1x2x128xi1> to vector<4x2x128xi1>
    %23 = vector.broadcast %cst : f32 to vector<4x2x128xf32>
    %24 = arith.select %22, %6, %23 : vector<4x2x128xi1>, vector<4x2x128xf32>
    %25 = tpu.iota {dimensions = array<i32: 1>} : vector<1x4xi32>
    %26 = vector.shape_cast %25 : vector<1x4xi32> to vector<4xi32>
    %27 = vector.shape_cast %26 : vector<4xi32> to vector<4x1x1xi32>
    %28 = vector.broadcast %8 : vector<1x2x128xi32> to vector<4x2x128xi32>
    %29 = vector.broadcast %27 : vector<4x1x1xi32> to vector<4x2x128xi32>
    %30 = arith.cmpi eq, %28, %29 : vector<4x2x128xi32>
    %31 = vector.broadcast %20 : vector<1x2x128xi1> to vector<4x2x128xi1>
    %32 = arith.andi %31, %30 : vector<4x2x128xi1>
    %cst_9 = arith.constant 1.000000e+00 : f32
    %cst_10 = arith.constant 0.000000e+00 : f32
    %33 = vector.broadcast %cst_9 : f32 to vector<4x2x128xf32>
    %34 = vector.broadcast %cst_10 : f32 to vector<4x2x128xf32>
    %35 = arith.select %32, %33, %34 : vector<4x2x128xi1>, vector<4x2x128xf32>
    %c0_11 = arith.constant 0 : index
    %c0_12 = arith.constant 0 : index
    %c0_13 = arith.constant 0 : index
    %c0_14 = arith.constant 0 : index
    %36 = vector.load %arg5[%c0_11, %c0_12, %c0_13, %c0_14] : memref<1x3x4x1xf32, #tpu.memory_space<vmem>>, vector<1x1x4x1xf32>
    %37 = vector.shape_cast %36 : vector<1x1x4x1xf32> to vector<4x1xf32>
    %38 = arith.mulf %24, %35 : vector<4x2x128xf32>
    %cst_15 = arith.constant dense<0.000000e+00> : vector<4x2xf32>
    %39 = vector.multi_reduction <add>, %38, %cst_15 [2] : vector<4x2x128xf32> to vector<4x2xf32>
    %cst_16 = arith.constant dense<0.000000e+00> : vector<4xf32>
    %40 = vector.multi_reduction <add>, %39, %cst_16 [1] : vector<4x2xf32> to vector<4xf32>
    %41 = vector.shape_cast %40 : vector<4xf32> to vector<4x1xf32>
    %42 = arith.addf %37, %41 : vector<4x1xf32>
    %c0_17 = arith.constant 0 : index
    %c0_18 = arith.constant 0 : index
    %c0_19 = arith.constant 0 : index
    %c0_20 = arith.constant 0 : index
    %43 = vector.load %arg5[%c0_17, %c0_18, %c0_19, %c0_20] : memref<1x3x4x1xf32, #tpu.memory_space<vmem>>, vector<1x1x4x1xf32>
    %44 = vector.shape_cast %43 : vector<1x1x4x1xf32> to vector<4x1xf32>
    %45 = vector.shape_cast %42 : vector<4x1xf32> to vector<1x1x4x1xf32>
    tpu.vector_store %arg5[%c0_17, %c0_18, %c0_19, %c0_20], %45 {strides = array<i32>} : memref<1x3x4x1xf32, #tpu.memory_space<vmem>>, vector<1x1x4x1xf32>,
    %c0_21 = arith.constant 0 : index
    %c1 = arith.constant 1 : index
    %c0_22 = arith.constant 0 : index
    %c0_23 = arith.constant 0 : index
    %46 = vector.load %arg5[%c0_21, %c1, %c0_22, %c0_23] : memref<1x3x4x1xf32, #tpu.memory_space<vmem>>, vector<1x1x4x1xf32>
    %47 = vector.shape_cast %46 : vector<1x1x4x1xf32> to vector<4x1xf32>
    %cst_24 = arith.constant dense<0.000000e+00> : vector<4x2xf32>
    %48 = vector.multi_reduction <add>, %35, %cst_24 [2] : vector<4x2x128xf32> to vector<4x2xf32>
    %cst_25 = arith.constant dense<0.000000e+00> : vector<4xf32>
    %49 = vector.multi_reduction <add>, %48, %cst_25 [1] : vector<4x2xf32> to vector<4xf32>
    %50 = vector.shape_cast %49 : vector<4xf32> to vector<4x1xf32>
    %51 = arith.addf %47, %50 : vector<4x1xf32>
    %c0_26 = arith.constant 0 : index
    %c1_27 = arith.constant 1 : index
    %c0_28 = arith.constant 0 : index
    %c0_29 = arith.constant 0 : index
    %52 = vector.load %arg5[%c0_26, %c1_27, %c0_28, %c0_29] : memref<1x3x4x1xf32, #tpu.memory_space<vmem>>, vector<1x1x4x1xf32>
    %53 = vector.shape_cast %52 : vector<1x1x4x1xf32> to vector<4x1xf32>
    %54 = vector.shape_cast %51 : vector<4x1xf32> to vector<1x1x4x1xf32>
    tpu.vector_store %arg5[%c0_26, %c1_27, %c0_28, %c0_29], %54 {strides = array<i32>} : memref<1x3x4x1xf32, #tpu.memory_space<vmem>>, vector<1x1x4x1xf32>,
    %c0_30 = arith.constant 0 : index
    %c2 = arith.constant 2 : index
    %c0_31 = arith.constant 0 : index
    %c0_32 = arith.constant 0 : index
    %55 = vector.load %arg5[%c0_30, %c2, %c0_31, %c0_32] : memref<1x3x4x1xf32, #tpu.memory_space<vmem>>, vector<1x1x4x1xf32>
    %56 = vector.shape_cast %55 : vector<1x1x4x1xf32> to vector<4x1xf32>
    %57 = arith.mulf %24, %24 : vector<4x2x128xf32>
    %cst_33 = arith.constant dense<0.000000e+00> : vector<4x2xf32>
    %58 = vector.multi_reduction <add>, %57, %cst_33 [2] : vector<4x2x128xf32> to vector<4x2xf32>
    %cst_34 = arith.constant dense<0.000000e+00> : vector<4xf32>
    %59 = vector.multi_reduction <add>, %58, %cst_34 [1] : vector<4x2xf32> to vector<4xf32>
    %60 = vector.shape_cast %59 : vector<4xf32> to vector<4x1xf32>
    %61 = arith.addf %56, %60 : vector<4x1xf32>
    %c0_35 = arith.constant 0 : index
    %c2_36 = arith.constant 2 : index
    %c0_37 = arith.constant 0 : index
    %c0_38 = arith.constant 0 : index
    %62 = vector.load %arg5[%c0_35, %c2_36, %c0_37, %c0_38] : memref<1x3x4x1xf32, #tpu.memory_space<vmem>>, vector<1x1x4x1xf32>
    %63 = vector.shape_cast %62 : vector<1x1x4x1xf32> to vector<4x1xf32>
    %64 = vector.shape_cast %61 : vector<4x1xf32> to vector<1x1x4x1xf32>
    tpu.vector_store %arg5[%c0_35, %c2_36, %c0_37, %c0_38], %64 {strides = array<i32>} : memref<1x3x4x1xf32, #tpu.memory_space<vmem>>, vector<1x1x4x1xf32>,
    return
  }
  func.func @transform_0(%arg0: i32, %arg1: i32, %arg2: i32) -> (i32, i32, i32, i32) {
    %c1_i32 = arith.constant 1 : i32
    %0 = arith.muli %arg0, %c1_i32 : i32
    %1 = arith.addi %0, %arg2 : i32
    %c0_i32 = arith.constant 0 : i32
    %2 = arith.minsi %1, %c0_i32 : i32
    %c0_i32_0 = arith.constant 0 : i32
    %c0_i32_1 = arith.constant 0 : i32
    %c0_i32_2 = arith.constant 0 : i32
    return %arg1, %c0_i32_0, %2, %c0_i32_1 : i32, i32, i32, i32
  }
  func.func @transform_1(%arg0: i32, %arg1: i32, %arg2: i32) -> (i32, i32, i32, i32) {
    %c1_i32 = arith.constant 1 : i32
    %0 = arith.muli %arg0, %c1_i32 : i32
    %1 = arith.addi %0, %arg2 : i32
    %c0_i32 = arith.constant 0 : i32
    %2 = arith.minsi %1, %c0_i32 : i32
    %c0_i32_0 = arith.constant 0 : i32
    %c0_i32_1 = arith.constant 0 : i32
    %c0_i32_2 = arith.constant 0 : i32
    return %arg1, %c0_i32_0, %2, %c0_i32_1 : i32, i32, i32, i32
  }
  func.func @transform_2(%arg0: i32, %arg1: i32, %arg2: i32) -> (i32, i32, i32, i32) {
    %c0_i32 = arith.constant 0 : i32
    %c0_i32_0 = arith.constant 0 : i32
    %c0_i32_1 = arith.constant 0 : i32
    %c0_i32_2 = arith.constant 0 : i32
    return %arg0, %c0_i32, %c0_i32_0, %c0_i32_1 : i32, i32, i32, i32
  }
}

</mosaic_0001>

<bundles_post_ra>
// kernel: tpu_custom_call.1
= control target key start
LH: loop header
LB: loop body
LE: loop exit
PB: predicated region body
PF: predicated region fallthrough
CT: control target
= control target key end

     0   :  { %7 = vsyncpa [#allocation3], 0  ;;  %s1020_s0 = inlined_call_operand.hbm [shape: f32[2,4,2,128], index: 0, kind: input, shape index: {}]   ;;  %s1021_s1 = inlined_call_operand.hbm [shape: s32[2,1,2,128], index: 1, kind: input, shape index: {}]   ;;  %s1022_s2 = inlined_call_operand.vmem [shape: f32[1,3,4,1], index: 2, kind: output, shape index: {}]  }
   0x1   :  { %9 = vsyncpa [#allocation3 + $0x1], 0 }
   0x2   :  { %10 = vsyncpa [#allocation5], 0 }
   0x3   :  { %12 = vsyncpa [#allocation5 + $0x1], 0  ;;  %s778_s9 = smov 0   ;;  %s780_s10 = smov 0  }
   0x4   :  { %s782_s11 = smov 0   ;;  %s784_s12 = smov 0  }
   0x5   :  { %s786_s13 = smov 0   ;;  %s788_s14 = smov 0  }
   0x6 LB: > { %s556_s15 = sadd.s32 4294967295, %s755_s14   ;;  %s33_s16 = sadd.s32 1, %s751_s13  ;;  %s755_s14 = sphi %s788_s14, %s18_s14   ;;  %s751_s13 = sphi %s786_s13, %s1034_s13   ;;  %s747_s12 = sphi %s784_s12, %s1033_s12   ;;  %s743_s11 = sphi %s782_s11, %s1032_s11   ;;  %s739_s10 = sphi %s780_s10, %s1031_s10   ;;  %s735_s9 = sphi %s778_s9, %s1030_s9  }
   0x7   : > { %p35_p0 = scmp.ge.s32.totalorder %s33_s16, 2  ;;  %s52_s17 = sadd.s32 1, %s743_s11 }
   0x8   : > { %p59_p1 = scmp.ne.s32.totalorder %s743_s11, %s739_s10  ;;  %p60_p2 = scmp.eq.s32.totalorder %s755_s14, 0 }
   0x9   : > { %s1036_s16 = smov (%p35_p0, %s33_s16), 0  ;;  %p65_p4 = scmp.ne.s32.totalorder %s739_s10, %s735_s9 }
   0xa   : > { %p814_p3 = por %p60_p2, %p59_p1  ;;  %s47_s19 = ssub.s32 %s751_s13, %s1036_s16 }
   0xb   : > { %p66_p5 = scmp.eq.s32.totalorder %s556_s15, 0  ;;  %p50_p6 = scmp.eq.s32.totalorder %s47_s19, 0 }
   0xc   : > { %p588_p8 = scmp.lt.s32.totalorder %s755_s14, 2  ;;  %s830_s22 = sand.u32 1, %s743_s11  }
   0xd   : > { %p821_p7 = por %p66_p5, %p65_p4  ;;  %s575_s23 = sshll.u32 %s751_s13, 7 }
   0xe   : > { %s827_s21 = scalar_select %p50_p6, %s743_s11, %s52_s17  }
   0xf   : > { %s1025_s20 = scalar_select %p821_p7, 1, 0 }
  0x10   : > { %s559_s24 = sshll.u32 %s830_s22, 3  ;;  %s837_s27 = scalar_lea.hbm %s1020_s0, %s575_s23 }
  0x11   : > { %s153_s28 = scalar_lea.vmem [#allocation2], %s559_s24  ;;  %p841_p9 = pnand %p588_p8, %p814_p3 }
  0x12   : > { %s164_s29 = sshll.u32 %s153_s28, 4  ;;  %s150_s3 = scalar_lea.sflag [#allocation3], %s830_s22  ;;  %s845_s29 = int_to_ptr.vmem [resolvable:$true] %s164_s29 }
  0x13   : > { %s641_s4 = scalar_lea.hbm %s837_s27, 128  ;;  %p643_p11 = pneg %p841_p9 }
  0x14   : > { %p642_p10 = scmp.ne.s32.totalorder %s837_s27, %s641_s4  ;;  %s646_s7 = scalar_lea.hbm %s1020_s0, 256 }
  0x15   : > { %p647_p0 = scmp.lt.u32.totalorder %s837_s27, %s1020_s0  ;;  %p648_p1 = scmp.lt.u32.totalorder %s646_s7, %s641_s4 }
  0x16   : > { %p644_p12 = pnand %p643_p11, %p642_p10  ;;  %p650_p3 = scmp.lt.u32.totalorder %s641_s4, %s837_s27 }
  0x17   : > { %p649_p2 = por %p648_p1, %p647_p0 }
  0x18   : > { %p645_p13 = pneg %p644_p12 }
  0x19   : > { %p651_p4 = por %p650_p3, %p649_p2 }
  0x1b   : > { %p652_p5 = pnand %p651_p4, %p645_p13 }
  0x1d   : > { %655 = shalt.err (!%p652_p5)
}
  0x1e   : > { %s656_s15 = scalar_lea.vmem %s845_s29, 128  ;;  %s757_s17 = smov [#allocation2]  }
  0x1f   : > { %p657_p6 = scmp.ne.s32.totalorder %s845_s29, %s656_s15  ;;  %s661_s18 = sshll.u32 %s757_s17, 4  ;;  %s662_s18 = int_to_ptr.vmem [resolvable:$false] %s661_s18 }
  0x20   : > { %s663_s19 = scalar_lea.vmem %s662_s18, 256  ;;  %p664_p12 = scmp.lt.s32.totalorder %s845_s29, %s662_s18 }
  0x21   : > { %p659_p8 = pnand %p657_p6, %p643_p11  ;;  %p665_p0 = scmp.lt.s32.totalorder %s663_s19, %s656_s15 }
  0x23   : > { %p660_p10 = pneg %p659_p8  ;;  %p666_p1 = por %p665_p0, %p664_p12 }
  0x25   : > { %p667_p2 = pnand %p666_p1, %p660_p10 }
  0x27   : > { %670 = shalt.err (!%p667_p2)
}
  0x28   : > { %s758_s23 = smov 32   ;;  %s759_s24 = smov 2  }
  0x29   : > { %584 = dma.hbm_to_vmem [thread:$0]  (!%p841_p9), %s837_s27, 128, %s845_s29, %s150_s3, %s758_s23, %s758_s23, %s759_s24  }
  0x2a   : > { %p564_p13 = scmp.ge.s32.totalorder %s755_s14, 1  ;;  %p194_p3 = scmp.lt.s32.totalorder %s755_s14, 3 }
  0x2b   : > { %s562_s25 = sshll.u32 %s830_s22, 1  ;;  %s563_s28 = sshll.u32 %s751_s13, 5 }
  0x2c   : > { %p878_p4 = pnand %p564_p13, %p194_p3  ;;  %s178_s4 = scalar_lea.vmem [#allocation4], %s562_s25 }
  0x2d   : > { %s189_s5 = sshll.u32 %s178_s4, 4  ;;  %s886_s8 = scalar_lea.hbm %s1021_s1, %s563_s28  ;;  %s190_s5 = int_to_ptr.vmem [resolvable:$true] %s189_s5 }
  0x2e   : > { %s1027_s26 = scalar_select %p878_p4, 1, 0 }
  0x2f   : > { %s175_s27 = scalar_lea.sflag [#allocation5], %s830_s22  ;;  %s671_s29 = scalar_lea.hbm %s886_s8, 32 }
  0x30   : > { %p672_p5 = scmp.ne.s32.totalorder %s886_s8, %s671_s29  ;;  %s676_s15 = scalar_lea.hbm %s1021_s1, 64 }
  0x31   : > { %p677_p10 = scmp.lt.u32.totalorder %s886_s8, %s1021_s1  ;;  %p678_p12 = scmp.lt.u32.totalorder %s676_s15, %s671_s29 }
  0x32   : > { %p674_p6 = pnand %p672_p5, %p643_p11  ;;  %p680_p1 = scmp.lt.u32.totalorder %s671_s29, %s886_s8 }
  0x33   : > { %p679_p0 = por %p678_p12, %p677_p10 }
  0x34   : > { %p675_p8 = pneg %p674_p6 }
  0x35   : > { %p681_p2 = por %p680_p1, %p679_p0 }
  0x37   : > { %p682_p13 = pnand %p681_p2, %p675_p8 }
  0x39   : > { %685 = shalt.err (!%p682_p13)
}
  0x3a   : > { %s686_s22 = scalar_lea.vmem %s190_s5, 32  ;;  %s760_s19 = smov [#allocation4]  }
  0x3b   : > { %p687_p3 = scmp.ne.s32.totalorder %s190_s5, %s686_s22  ;;  %s691_s23 = sshll.u32 %s760_s19, 4  ;;  %s692_s23 = int_to_ptr.vmem [resolvable:$false] %s691_s23 }
  0x3c   : > { %s693_s24 = scalar_lea.vmem %s692_s23, 64  ;;  %p694_p7 = scmp.lt.s32.totalorder %s190_s5, %s692_s23 }
  0x3d   : > { %p689_p5 = pnand %p687_p3, %p643_p11  ;;  %p695_p4 = scmp.lt.s32.totalorder %s693_s24, %s686_s22 }
  0x3f   : > { %p690_p6 = pneg %p689_p5  ;;  %p696_p10 = por %p695_p4, %p694_p7 }
  0x41   : > { %p697_p12 = pnand %p696_p10, %p690_p6 }
  0x43   : > { %700 = shalt.err (!%p697_p12)
}
  0x44   : > { %587 = dma.hbm_to_vmem [thread:$0]  (!%p841_p9), %s886_s8, 32, %s190_s5, %s175_s27  }
  0x45   : > { %p1028_p8 = scmp.ne.s32.totalorder %s1027_s26, 0 }
  0x46   : > { %s200_s25 = sand.u32 (!%p1028_p8), 1, %s739_s10   ;;  %p1029_p11 = scmp.ne.s32.totalorder (!%p1028_p8), %s1025_s20, 0 }
  0x47   : > { %198 = sbr.rel (%p1028_p8) target bundleno = 531 (0x213), region = 28  ;;  %s565_s28 = sshll.u32 (!%p1028_p8), %s200_s25, 3 }
  0x48   : > { %s201_s4 = scalar_lea.sflag (!%p1028_p8), [#allocation3], %s200_s25  ;;  %s911_s6 = scalar_lea.vmem (!%p1028_p8), [#allocation2], %s565_s28 }
  0x4e   : > { %726 = dma.done.wait (%p1029_p11), %s201_s4, 128  }
  0x4f   : > { %728 = vsyncadd (%p1029_p11), %s201_s4, 4294967168  ;;  %s566_s7 = sshll.u32 %s200_s25, 1  ;;  %s210_s30 = scalar_lea.sflag [#allocation5], %s200_s25 }
  0x50   : > { %s917_s29 = scalar_lea.vmem [#allocation4], %s566_s7 }
  0x51   : > { %730 = dma.done.wait (%p1029_p11), %s210_s30, 32  }
  0x52   : > { %732 = vsyncadd (%p1029_p11), %s210_s30, 4294967264  ;;  %p250_p7 = scmp.eq.s32.totalorder %s747_s12, 0 }
  0x53   : > { %vm256_vm0 = vcmask (%p250_p7), 3072   ;;  %v761_v0 = vmov (%p250_p7), 0.0  }
  0x54   : > { %255 = sbr.rel (!%p250_p7) target bundleno = 91 (0x5b), region = 40  ;;  %257 = vst.msk [vmem:[%s1022_s2] sm:$0xf] (%p250_p7), %vm256_vm0, %v761_v0  ;;  %258 = vst.msk [vmem:[%s1022_s2 + $0x4] sm:$0xf] (%p250_p7), %vm256_vm0, %v761_v0 }
  0x55   : > { %259 = vst.msk [vmem:[%s1022_s2 + $0x8] sm:$0xf] (%p250_p7), %vm256_vm0, %v761_v0 }
  0x5b PF: > { %v267_v1 = vlaneseq  ;;  %v260_v7 = vld [vmem:[%s911_s6] sm:$0x3]  ;;  %v261_v8 = vld [vmem:[%s911_s6 + $0x2] sm:$0x3]  ;;  %v262_v9 = vld [vmem:[%s911_s6 + $0x4] sm:$0x3] }
  0x5c   : > { %vm318_vm2 = vcmask 1041408   ;;  %v264_v24 = vld [vmem:[%s917_s29] sm:$0x3]  ;;  %v762_v29 = vmov 0.0   ;;  %v263_v41 = vld [vmem:[%s911_s6 + $0x6] sm:$0x3] }
  0x5d   : > { %v272_v2 = vand.u32 127, %v267_v1  ;;  %v268_v3 = vshrl.u32 %v267_v1, 7  ;;  %vm351_vm11 = vcmask 1041409   ;;  %vm355_vm12 = vcmask 1043459  }
  0x5e   : > { %vm353_vm13 = vcmask 1042434   ;;  %vm358_vm14 = vcmask 11264   ;;  %vm363_vm15 = vcmask 3072  }
  0x5f   : > { %283 = vbcast.lane.b32.xlu0 %v272_v2, 256  ;;  %v273_v4 = vmul.u32 128, %v268_v3  ;;  %v933_v5 = vsub.s32 %v272_v2, %v268_v3  ;;  %v287_v19 = vsub.s32 0, %v268_v3  ;;  %v291_v20 = vsub.s32 1, %v268_v3 }
  0x60   : > { %v299_v21 = vsub.s32 3, %v268_v3  ;;  %v295_v22 = vsub.s32 2, %v268_v3 }
  0x61   : > { %v274_v6 = vadd.s32 %v273_v4, %v272_v2 }
  0x63   : > { %vm275_vm1 = vcmp.lt.s32.totalorder %v274_v6, 256 }
  0x64   : > { %v278_v10 = vsel %vm275_vm1, %v260_v7, 0.0  ;;  %v279_v11 = vsel %vm275_vm1, %v261_v8, 0.0  ;;  %v280_v14 = vsel %vm275_vm1, %v262_v9, 0.0  ;;  %v281_v44 = vsel %vm275_vm1, %v263_v41, 0.0 }
  0x65   : > { %v410_v12 = vmul.f32 %v278_v10, %v278_v10  ;;  %v411_v13 = vmul.f32 %v279_v11, %v279_v11  ;;  %v412_v17 = vmul.f32 %v280_v14, %v280_v14  ;;  %v413_v47 = vmul.f32 %v281_v44, %v281_v44 }
  0x67   : > { %v414_v15 = vsel %vm318_vm2, %v410_v12, 0.0  ;;  %v417_v16 = vsel %vm318_vm2, %v411_v13, 0.0  ;;  %v420_v18 = vsel %vm318_vm2, %v412_v17, 0.0  ;;  %v423_v49 = vsel %vm318_vm2, %v413_v47, 0.0 }
  0x68   : > { %415 = vadd.xlane.f32.xlu1 %v414_v15 }
  0x6c   : > { %418 = vadd.xlane.f32.xlu1 %v417_v16 }
  0x70   : > { %421 = vadd.xlane.f32.xlu1 %v420_v18 }
  0xd1   : > { %v284_v23 = vpop.permute.xlu0 %283 }
  0xd2   : > { %v288_v25 = vrot.slane %v284_v23, %v287_v19  ;;  %v292_v26 = vrot.slane %v284_v23, %v291_v20  ;;  %v300_v27 = vrot.slane %v284_v23, %v299_v21  ;;  %v296_v28 = vrot.slane %v284_v23, %v295_v22  ;;  %v568_v23 = vld [vmem:[%s1022_s2 + $0x4] sm:$0xf] }
  0xd4   : > { %vm301_vm3 = vcmp.eq.s32.totalorder %v264_v24, %v288_v25  ;;  %vm302_vm4 = vcmp.eq.s32.totalorder %v264_v24, %v292_v26  ;;  %vm304_vm5 = vcmp.eq.s32.totalorder %v264_v24, %v300_v27  ;;  %vm303_vm8 = vcmp.eq.s32.totalorder %v264_v24, %v296_v28  ;;  %v570_v28 = vld [vmem:[%s1022_s2 + $0x8] sm:$0xf] }
  0xd5   : > { %vm305_vm6 = vmand %vm275_vm1, %vm301_vm3 }
  0xd6   : > { %v309_v30 = vsel %vm305_vm6, 1.0, %v762_v29  ;;  %vm306_vm7 = vmand %vm275_vm1, %vm302_vm4 }
  0xd7   : > { %v367_v31 = vsel %vm318_vm2, %v309_v30, 0.0  ;;  %v314_v32 = vmul.f32 %v309_v30, %v278_v10  ;;  %vm308_vm9 = vmand %vm275_vm1, %vm304_vm5  ;;  %v310_v33 = vsel %vm306_vm7, 1.0, %v762_v29 }
  0xd8   : > { %368 = vadd.xlane.f32.xlu1 %v367_v31  ;;  %vm307_vm10 = vmand %vm275_vm1, %vm303_vm8  ;;  %v312_v35 = vsel %vm308_vm9, 1.0, %v762_v29  ;;  %v370_v36 = vsel %vm318_vm2, %v310_v33, 0.0  ;;  %v315_v40 = vmul.f32 %v310_v33, %v279_v11 }
  0xd9   : > { %v319_v34 = vsel %vm318_vm2, %v314_v32, 0.0  ;;  %v311_v37 = vsel %vm307_vm10, 1.0, %v762_v29  ;;  %v376_v38 = vsel %vm318_vm2, %v312_v35, 0.0  ;;  %v317_v46 = vmul.f32 %v312_v35, %v281_v44 }
  0xda   : > { %320 = vadd.xlane.f32.xlu0 %v319_v34  ;;  %v373_v39 = vsel %vm318_vm2, %v311_v37, 0.0  ;;  %v322_v42 = vsel %vm318_vm2, %v315_v40, 0.0  ;;  %v316_v43 = vmul.f32 %v311_v37, %v280_v14 }
  0xdb   : > { %v328_v48 = vsel %vm318_vm2, %v317_v46, 0.0 }
  0xdc   : > { %371 = vadd.xlane.f32.xlu1 %v370_v36  ;;  %v325_v45 = vsel %vm318_vm2, %v316_v43, 0.0 }
  0xde   : > { %377 = vadd.xlane.f32.xlu0 %v376_v38 }
  0xe0   : > { %374 = vadd.xlane.f32.xlu1 %v373_v39 }
  0xe4   : > { %323 = vadd.xlane.f32.xlu1 %v322_v42 }
  0xe8   : > { %326 = vadd.xlane.f32.xlu1 %v325_v45 }
  0xec   : > { %329 = vadd.xlane.f32.xlu1 %v328_v48 }
  0xf0   : > { %424 = vadd.xlane.f32.xlu1 %v423_v49 }
  0xf5   : > { %v416_v50 = vpop.xlane.xlu1 %415 }
  0xf6   : > { %v433_v7 = vrot.slane %v416_v50, %v933_v5 }
  0xf9   : > { %v419_v51 = vpop.xlane.xlu1 %418 }
  0xfa   : > { %v437_v8 = vrot.slane %v419_v51, %v933_v5 }
  0xfc   : > { %v446_v15 = vsel %vm351_vm11, %v437_v8, %v433_v7 }
  0xfd   : > { %v422_v52 = vpop.xlane.xlu1 %421 }
  0xfe   : > { %v441_v13 = vrot.slane %v422_v52, %v933_v5 }
 0x100   : > { %v447_v20 = vsel %vm353_vm13, %v441_v13, %v446_v15 }
 0x165   : > { %v369_v53 = vpop.xlane.xlu1 %368 }
 0x166   : > { %v386_v58 = vrot.slane %v369_v53, %v933_v5 }
 0x167   : > { %v321_v54 = vpop.xlane.xlu0 %320 }
 0x168   : > { %v338_v9 = vrot.slane %v321_v54, %v933_v5 }
 0x169   : > { %v372_v55 = vpop.xlane.xlu1 %371 }
 0x16a   : > { %v390_v56 = vrot.slane %v372_v55, %v933_v5 }
 0x16b   : > { %v378_v57 = vpop.xlane.xlu0 %377 }
 0x16c   : > { %v399_v61 = vsel %vm351_vm11, %v390_v56, %v386_v58  ;;  %v398_v62 = vrot.slane %v378_v57, %v933_v5 }
 0x16d   : > { %v375_v59 = vpop.xlane.xlu1 %374 }
 0x16e   : > { %v394_v60 = vrot.slane %v375_v59, %v933_v5 }
 0x170   : > { %v400_v63 = vsel %vm353_vm13, %v394_v60, %v399_v61 }
 0x171   : > { %v324_v0 = vpop.xlane.xlu1 %323  ;;  %v401_v1 = vsel %vm355_vm12, %v398_v62, %v400_v63 }
 0x172   : > { %v403_v2 = vsel %vm358_vm14, %v401_v1, 0.0  ;;  %v342_v4 = vrot.slane %v324_v0, %v933_v5 }
 0x173   : > { %404 = vadd.xlane.f32.xlu1 %v403_v2 }
 0x174   : > { %v352_v11 = vsel %vm351_vm11, %v342_v4, %v338_v9 }
 0x175   : > { %v327_v3 = vpop.xlane.xlu1 %326 }
 0x176   : > { %v346_v6 = vrot.slane %v327_v3, %v933_v5 }
 0x178   : > { %v354_v14 = vsel %vm353_vm13, %v346_v6, %v352_v11 }
 0x179   : > { %v330_v10 = vpop.xlane.xlu1 %329 }
 0x17a   : > { %v350_v12 = vrot.slane %v330_v10, %v933_v5 }
 0x17c   : > { %v356_v16 = vsel %vm355_vm12, %v350_v12, %v354_v14 }
 0x17d   : > { %v425_v17 = vpop.xlane.xlu1 %424  ;;  %v359_v18 = vsel %vm358_vm14, %v356_v16, 0.0 }
 0x17e   : > { %v445_v19 = vrot.slane %v425_v17, %v933_v5  ;;  %360 = vadd.xlane.f32.xlu0 %v359_v18  ;;  %v313_v5 = vld [vmem:[%s1022_s2] sm:$0xf] }
 0x180   : > { %v448_v21 = vsel %vm355_vm12, %v445_v19, %v447_v20 }
 0x181   : > { %v450_v22 = vsel %vm358_vm14, %v448_v21, 0.0 }
 0x182   : > { %451 = vadd.xlane.f32.xlu0 %v450_v22 }
 0x200   : > { %v405_v24 = vpop.xlane.xlu1 %404 }
 0x201   : > { %v406_v25 = vadd.f32 %v568_v23, %v405_v24 }
 0x203   : > { %569 = vst.msk [vmem:[%s1022_s2 + $0x4] sm:$0xf] %vm363_vm15, %v406_v25 }
 0x20b   : > { %v361_v26 = vpop.xlane.xlu0 %360 }
 0x20c   : > { %v362_v27 = vadd.f32 %v361_v26, %v313_v5 }
 0x20e   : > { %364 = vst.msk [vmem:[%s1022_s2] sm:$0xf] %vm363_vm15, %v362_v27 }
 0x20f   : > { %v452_v29 = vpop.xlane.xlu0 %451 }
 0x210   : > { %v453_v30 = vadd.f32 %v570_v28, %v452_v29 }
 0x212   : > { %571 = vst.msk [vmem:[%s1022_s2 + $0x8] sm:$0xf] %vm363_vm15, %v453_v30 }
 0x213 PF: > { %s18_s14 = sadd.s32 1, %s755_s14   ;;  %s1030_s9 = smov %s739_s10 }
 0x214   : > { %p15_p9 = scmp.ge.s32.totalorder %s18_s14, 4   ;;  %s1031_s10 = smov %s743_s11 }
 0x215   : > { %s1032_s11 = smov %s827_s21  ;;  %s1033_s12 = smov %s751_s13 }
 0x216   : > { %s1034_s13 = smov %s1036_s16  ;;  %17 = sbr.rel (!%p15_p9) target bundleno = 6 (0x6), region = 87 }
 0x21d   :  { %476 = vsyncpa [#allocation3], 1 }
 0x21e   :  { %478 = vsyncpa [#allocation3 + $0x1], 1 }
 0x21f   :  { %479 = vsyncpa [#allocation5], 1 }
 0x220   :  { %481 = vsyncpa [#allocation5 + $0x1], 1 }

</bundles_post_ra>
